<compile_context>
chip_gen: v5e
topology: v5e:2x2
jax: 0.10.0
libtpu: 0.0.40
codegen_flags: <defaults>
</compile_context>

<pallas_src>
import jax
import jax.numpy as jnp
from jax.experimental import pallas as pl
from jax.experimental.pallas import tpu as pltpu


def _round_up(n, m):
    return ((n + m - 1) // m) * m


# ----------------------------- Pallas kernel -------------------------------
def _encoder_kernel(x_ref, w_ref, b_ref, o_ref):
    # One grid step: (tm, D_in) f32 row tile @ (D_in, tn) f32 weight stripe on
    # the MXU with f32 accumulation; bias add on the VPU; direct store.
    acc = jnp.dot(x_ref[...], w_ref[...], preferred_element_type=jnp.float32)
    o_ref[...] = (acc + b_ref[...]).astype(o_ref.dtype)


# --------------------------- tiling heuristics ------------------------------
def _vmem_budget_bytes():
    """Per-core VMEM we allow ourselves (physical capacity minus headroom)."""
    cap = 64 * 1024 * 1024  # conservative fallback (v7x per-TC VMEM)
    try:
        info = pltpu.get_tpu_info()
        cap = int(getattr(info, "vmem_capacity_bytes", cap))
    except Exception:
        pass
    # Leave ~25% for compiler-internal scratch / pipeline bookkeeping:
    # v7x (64 MiB) -> 48 MiB, v5e/v6e (128 MiB) -> 96 MiB.
    return max(32 * 1024 * 1024, (cap * 3) // 4)


def _choose_tiles(M, D_in, E, vmem_budget):
    itm = 4  # float32 bytes

    # tn: keep the full E-wide weight resident if its double-buffered stripe
    # fits in ~half the budget; otherwise stream it in multiples of 128 lanes.
    w_budget = vmem_budget // 2
    if 2 * D_in * E * itm <= w_budget:
        tn = E
    else:
        tn = (w_budget // (2 * D_in * itm)) // 128 * 128
        tn = int(max(128, min(tn, _round_up(E, 128))))
    n_col_blocks = pl.cdiv(E, tn)

    # tm: target ~2 MiB of per-step tile traffic so the ~0.35 us fixed
    # per-grid-step overhead is amortized; clamp and fit the leftover budget.
    tm = (2 * 1024 * 1024) // ((D_in + tn) * itm)
    tm = max(256, min(2048, tm))
    avail = vmem_budget - 2 * D_in * tn * itm - 2 * 8 * tn * itm
    tm = min(tm, max(8, avail // (2 * (D_in + tn) * itm)))
    tm = min(tm, _round_up(M, 8))

    # Balance the row grid: >= 2 row tiles when there is enough work (v7x
    # megacore) and roughly equal tile sizes (no mostly-masked tail tile).
    n_row_blocks = pl.cdiv(M, tm)
    if M > 512 and n_row_blocks == 1:
        n_row_blocks = 2
    tm = _round_up(pl.cdiv(M, n_row_blocks), 8)
    n_row_blocks = pl.cdiv(M, tm)

    return int(tm), int(tn), int(n_row_blocks), int(n_col_blocks)


# ------------------------------- wrapper ------------------------------------
def cpc_shell_v2_forward(x, w_enc, b_enc, *, out_dtype=jnp.float32):
    """CPCShellV2.forward: returns z = encoder(x).

    x:     (B, T, D_in) float32
    w_enc: (D_in, E)    float32
    b_enc: (E,) or (1, E) float32
    returns z: (B, T, E) in `out_dtype` (float32 by default = module return)
    """
    B, T, D_in = x.shape
    E = w_enc.shape[1]
    M = B * T

    vmem_budget = _vmem_budget_bytes()
    tm, tn, n_row_blocks, n_col_blocks = _choose_tiles(M, D_in, E, vmem_budget)

    # Free reshapes only -- no casts, pads, or slices that would add extra
    # HBM passes over x or z.
    x2d = x.reshape(M, D_in)
    b = b_enc.reshape(1, E).astype(jnp.float32)

    # VMEM footprint: double-buffered x tile + weight stripe + bias (sublane
    # padded to 8 rows in VMEM) + output tile.
    tile_bytes = (2 * tm * D_in * 4
                  + 2 * D_in * tn * 4
                  + 2 * 8 * tn * 4
                  + 2 * tm * tn * 4)
    vmem_limit = int(min(vmem_budget, max(2 * tile_bytes, 16 * 1024 * 1024)))

    out_itemsize = jnp.dtype(out_dtype).itemsize
    cost = pl.CostEstimate(
        flops=2 * M * D_in * E,
        transcendentals=0,
        bytes_accessed=(n_col_blocks * M * D_in * 4   # x re-read per col stripe
                        + D_in * E * 4                # weight read once
                        + E * 4                       # bias
                        + M * E * out_itemsize),      # output write
    )

    # Grid: (column stripes, row tiles); rows innermost so a weight stripe is
    # DMA'd once per column block and stays resident across all row tiles.
    z2d = pl.pallas_call(
        _encoder_kernel,
        out_shape=jax.ShapeDtypeStruct((M, E), out_dtype),
        grid_spec=pltpu.PrefetchScalarGridSpec(
            num_scalar_prefetch=0,
            grid=(n_col_blocks, n_row_blocks),
            in_specs=[
                pl.BlockSpec((tm, D_in), lambda j, i: (i, 0)),   # x row tile
                pl.BlockSpec((D_in, tn), lambda j, i: (0, j)),   # weight stripe
                pl.BlockSpec((1, tn), lambda j, i: (0, j)),      # bias stripe
            ],
            out_specs=pl.BlockSpec((tm, tn), lambda j, i: (i, j)),
        ),
        compiler_params=pltpu.CompilerParams(
            dimension_semantics=("parallel", "parallel"),
            vmem_limit_bytes=vmem_limit,
        ),
        cost_estimate=cost,
    )(x2d, w_enc, b)

    # TODO(synk): add K-tiling (f32 VMEM accumulator + pl.when init/finalize,
    # reduction axis last/"arbitrary") if an encoder ever has D_in too large
    # for a (tm, D_in) tile plus a (D_in, tn) stripe in VMEM.
    return z2d.reshape(B, T, E)


# ----------------------------- module setup --------------------------------
def init_cpc_shell_v2_params(key, in_dim, embedding_size, k_pos_samples):
    """Deterministic parameter init matching CPCShellV2.__init__ shapes."""
    k_enc_w, k_enc_b, k_pred_w, k_pred_b = jax.random.split(key, 4)

    # Encoder (injected module): Linear(in_dim -> embedding_size)
    w_enc = jax.random.normal(k_enc_w, (in_dim, embedding_size), jnp.float32) * 0.02
    b_enc = jax.random.normal(k_enc_b, (1, embedding_size), jnp.float32) * 0.02

    # linear_predictor: Linear(embedding_size*(k_pos_samples-1) -> embedding_size)
    # Declared in __init__ but unused in forward; initialized for fidelity.
    history_size = k_pos_samples - 1
    w_pred = jax.random.normal(
        k_pred_w, (embedding_size * history_size, embedding_size), jnp.float32
    ) * 0.02
    b_pred = jax.random.normal(k_pred_b, (embedding_size,), jnp.float32) * 0.02

    return {"w_enc": w_enc, "b_enc": b_enc, "w_pred": w_pred, "b_pred": b_pred}


if __name__ == "__main__":
    key = jax.random.PRNGKey(0)

    # Small shapes consistent with the module: batch=8, seq=100 (M=800 rows,
    # exercises the uneven/balanced row tiling), input feature dim 32,
    # embedding_size 64, k_pos_samples 4.
    B, T, D_in = 8, 100, 32
    EMB = 64
    K_POS = 4

    k_x, k_p = jax.random.split(key)
    x = jax.random.normal(k_x, (B, T, D_in), jnp.float32)
    params = init_cpc_shell_v2_params(k_p, D_in, EMB, K_POS)

    z = cpc_shell_v2_forward(x, params["w_enc"], params["b_enc"])
    z = jax.block_until_ready(z)
    assert z.shape == (B, T, EMB)
    assert z.dtype == jnp.float32

    # Reference: full-f32 semantics of the original module's forward.
    z_ref = (x.reshape(B * T, D_in) @ params["w_enc"]
             + params["b_enc"]).reshape(B, T, EMB)
    assert jnp.allclose(z, z_ref, atol=2e-3, rtol=2e-3), (
        float(jnp.max(jnp.abs(z - z_ref))))

    print("KERNEL_OK")
</pallas_src>

<mosaic_0001>
module attributes {stable_mosaic.version = 11 : i64} {
  func.func @_encoder_kernel(%arg0: i32, %arg1: i32, %arg2: memref<400x32xf32, #tpu.memory_space<vmem>>, %arg3: memref<32x64xf32, #tpu.memory_space<vmem>>, %arg4: memref<1x64xf32, #tpu.memory_space<vmem>>, %arg5: memref<400x64xf32, #tpu.memory_space<vmem>>) attributes {dimension_semantics = [#tpu.dimension_semantics<parallel>, #tpu.dimension_semantics<parallel>], iteration_bounds = array<i64: 1, 2>, scalar_prefetch = 0 : i64, scratch_operands = 0 : i64, tpu.core_type = #tpu.core_type<tc>, window_params = [{transform_indices = @transform_0, window_bounds = array<i64: 400, 32>}, {transform_indices = @transform_1, window_bounds = array<i64: 32, 64>}, {transform_indices = @transform_2, window_bounds = array<i64: 1, 64>}, {transform_indices = @transform_3, window_bounds = array<i64: 400, 64>}]} {
    %c0 = arith.constant 0 : index
    %c0_0 = arith.constant 0 : index
    %0 = vector.load %arg2[%c0, %c0_0] : memref<400x32xf32, #tpu.memory_space<vmem>>, vector<400x32xf32>
    %c0_1 = arith.constant 0 : index
    %c0_2 = arith.constant 0 : index
    %1 = vector.load %arg3[%c0_1, %c0_2] : memref<32x64xf32, #tpu.memory_space<vmem>>, vector<32x64xf32>
    %cst = arith.constant dense<0.000000e+00> : vector<400x64xf32>
    %2 = tpu.matmul %0, %1, %cst {dimension_numbers = #tpu.dot_dimension_numbers<[1], [0], [0], [1], [0, 0, 1, 1], [], []>} : vector<400x32xf32>, vector<32x64xf32>, vector<400x64xf32> -> vector<400x64xf32>
    %c0_3 = arith.constant 0 : index
    %c0_4 = arith.constant 0 : index
    %3 = vector.load %arg4[%c0_3, %c0_4] : memref<1x64xf32, #tpu.memory_space<vmem>>, vector<1x64xf32>
    %4 = vector.broadcast %3 : vector<1x64xf32> to vector<400x64xf32>
    %5 = arith.addf %2, %4 : vector<400x64xf32>
    %c0_5 = arith.constant 0 : index
    %c0_6 = arith.constant 0 : index
    %6 = vector.load %arg5[%c0_5, %c0_6] : memref<400x64xf32, #tpu.memory_space<vmem>>, vector<400x64xf32>
    tpu.vector_store %arg5[%c0_5, %c0_6], %5 {strides = array<i32>} : memref<400x64xf32, #tpu.memory_space<vmem>>, vector<400x64xf32>,
    return
  }
  func.func @transform_0(%arg0: i32, %arg1: i32) -> (i32, i32) {
    %c0_i32 = arith.constant 0 : i32
    %c0_i32_0 = arith.constant 0 : i32
    return %arg1, %c0_i32 : i32, i32
  }
  func.func @transform_1(%arg0: i32, %arg1: i32) -> (i32, i32) {
    %c0_i32 = arith.constant 0 : i32
    %c0_i32_0 = arith.constant 0 : i32
    return %c0_i32, %arg0 : i32, i32
  }
  func.func @transform_2(%arg0: i32, %arg1: i32) -> (i32, i32) {
    %c0_i32 = arith.constant 0 : i32
    %c0_i32_0 = arith.constant 0 : i32
    return %c0_i32, %arg0 : i32, i32
  }
  func.func @transform_3(%arg0: i32, %arg1: i32) -> (i32, i32) {
    %c0_i32 = arith.constant 0 : i32
    return %arg1, %arg0 : i32, i32
  }
}

</mosaic_0001>

<bundles_post_ra>
// kernel: tpu_custom_call.1
= control target key start
LH: loop header
LB: loop body
LE: loop exit
PB: predicated region body
PF: predicated region fallthrough
CT: control target
= control target key end

     0   :  { %s896_s12 = smov 0   ;;  %s898_s13 = smov 0   ;;  %s1207_s0 = inlined_call_operand.vmem [shape: f32[800,32], index: 0, kind: input, shape index: {}]   ;;  %s1208_s1 = inlined_call_operand.vmem [shape: f32[32,64], index: 1, kind: input, shape index: {}]   ;;  %s1209_s2 = inlined_call_operand.vmem [shape: f32[1,64], index: 2, kind: input, shape index: {}]   ;;  %s1210_s3 = inlined_call_operand.vmem [shape: f32[800,64], index: 3, kind: output, shape index: {}]  }
   0x1   :  { %s900_s14 = smov 0  }
   0x2 LB: > { %s22_s15 = sadd.s32 1, %s870_s13  ;;  %p760_p0 = scmp.ge.s32.totalorder %s874_s14, 1  ;;  %s874_s14 = sphi %s900_s14, %s13_s14   ;;  %s870_s13 = sphi %s898_s13, %s1212_s13   ;;  %s866_s12 = sphi %s896_s12, %s1211_s12  }
   0x3   : > { %p23_p1 = scmp.ge.s32.totalorder %s22_s15, 2  ;;  %p169_p2 = scmp.lt.s32.totalorder %s874_s14, 3 }
   0x5   : > { %s1214_s15 = smov (%p23_p1, %s22_s15), 0  ;;  %p170_p3 = pnand %p760_p0, %p169_p2 }
   0x6   : > { %s203_s20 = smul.u32 (!%p170_p3), 50, %s866_s12 }
   0x7   : > { %173 = sbr.rel (%p170_p3) target bundleno = 252 (0xfc), region = 32 }
   0x8   : > { %p204_p4 = scmp.lt.s32.totalorder (!%p170_p3), %s203_s20, 99 }
   0xc   : > { %v278_v0 = vld [vmem:[%s1208_s1 + $0x18] sm:$0xff]  ;;  %v277_v1 = vld [vmem:[%s1208_s1 + $0x10] sm:$0xff]  ;;  %v276_v2 = vld [vmem:[%s1208_s1 + $0x8] sm:$0xff]  ;;  %s1216_s20 = smov (!%p204_p4, %s203_s20), 99  ;;  %vm283_vm0 = vcmask 261120   ;;  %vm601_vm1 = vcmask 523264  }
   0xd   : > { %816 = vmatpush.msra.mxu2 %v278_v0  ;;  %815 = vmatpush.msra.mxu1 %v278_v0  ;;  %v275_v3 = vld [vmem:[%s1208_s1] sm:$0xff]  ;;  %s761_s25 = sshll.u32 %s1216_s20, 3 }
   0xe   : > { %817 = vmatpush.msra.mxu3 %v278_v0  ;;  %446 = vmatpush.msra.mxu0 %v278_v0  ;;  %s934_s28 = scalar_lea.vmem %s1207_s0, %s761_s25  ;;  %v1039_v54 = vld [vmem:[%s1209_s2] ss:$0 sm:$0xff]  ;;  %s1046_s6 = scalar_lea.vmem %s1210_s3, %s761_s25 }
   0xf   : > { %819 = vmatpush.msra.mxu2 %v277_v1  ;;  %818 = vmatpush.msra.mxu1 %v277_v1  ;;  %v250_v4 = vld [vmem:[%s934_s28 + $0xc8] sm:$0xff]  ;;  %v237_v5 = vld [vmem:[%s934_s28 + $0x60] sm:$0xff]  ;;  %v263_v6 = vld [vmem:[%s934_s28 + $0x130] sm:$0xff] }
  0x10   : > { %820 = vmatpush.msra.mxu3 %v277_v1  ;;  %447 = vmatpush.msra.mxu0 %v277_v1  ;;  %v225_v7 = vld [vmem:[%s934_s28] sm:$0xff]  ;;  %v251_v8 = vld [vmem:[%s934_s28 + $0xd0] sm:$0xff]  ;;  %v238_v9 = vld [vmem:[%s934_s28 + $0x68] sm:$0xff] }
  0x11   : > { %822 = vmatpush.msra.mxu2 %v276_v2  ;;  %821 = vmatpush.msra.mxu1 %v276_v2  ;;  %v264_v10 = vld [vmem:[%s934_s28 + $0x138] sm:$0xff]  ;;  %v226_v11 = vld [vmem:[%s934_s28 + $0x8] sm:$0xff]  ;;  %v239_v13 = vld [vmem:[%s934_s28 + $0x70] sm:$0xff] }
  0x12   : > { %823 = vmatpush.msra.mxu3 %v276_v2  ;;  %448 = vmatpush.msra.mxu0 %v276_v2  ;;  %v252_v12 = vld [vmem:[%s934_s28 + $0xd8] sm:$0xff]  ;;  %v265_v14 = vld [vmem:[%s934_s28 + $0x140] sm:$0xff]  ;;  %v227_v15 = vld [vmem:[%s934_s28 + $0x10] sm:$0xff] }
  0x13   : > { %825 = vmatpush.msra.mxu2 %v275_v3  ;;  %824 = vmatpush.msra.mxu1 %v275_v3  ;;  %v253_v16 = vld [vmem:[%s934_s28 + $0xe0] sm:$0xff]  ;;  %v240_v17 = vld [vmem:[%s934_s28 + $0x78] sm:$0xff]  ;;  %v266_v18 = vld [vmem:[%s934_s28 + $0x148] sm:$0xff] }
  0x14   : > { %826 = vmatpush.msra.mxu3 %v275_v3  ;;  %449 = vmatpush.msra.mxu0 %v275_v3  ;;  %v228_v19 = vld [vmem:[%s934_s28 + $0x18] sm:$0xff]  ;;  %v254_v20 = vld [vmem:[%s934_s28 + $0xe8] sm:$0xff]  ;;  %v241_v21 = vld [vmem:[%s934_s28 + $0x80] sm:$0xff] }
  0x15   : > { %788 = vmatmul.msk.f32.vlgmr.msra.gmra.mxu2 %vm283_vm0, %v250_v4  ;;  %775 = vmatmul.msk.f32.vlgmr.msra.gmra.mxu1 %vm283_vm0, %v237_v5  ;;  %v267_v22 = vld [vmem:[%s934_s28 + $0x150] sm:$0xff]  ;;  %v229_v23 = vld [vmem:[%s934_s28 + $0x20] sm:$0xff]  ;;  %v242_v25 = vld [vmem:[%s934_s28 + $0x88] sm:$0xff] }
  0x16   : > { %801 = vmatmul.msk.f32.vlgmr.msra.gmra.mxu3 %vm283_vm0, %v263_v6  ;;  %763 = vmatmul.msk.f32.vlgmr.msra.gmra.mxu0 %vm283_vm0, %v225_v7  ;;  %v255_v24 = vld [vmem:[%s934_s28 + $0xf0] sm:$0xff]  ;;  %v268_v26 = vld [vmem:[%s934_s28 + $0x158] sm:$0xff]  ;;  %v230_v27 = vld [vmem:[%s934_s28 + $0x28] sm:$0xff] }
  0x17   : > { %v256_v28 = vld [vmem:[%s934_s28 + $0xf8] sm:$0xff]  ;;  %v243_v29 = vld [vmem:[%s934_s28 + $0x90] sm:$0xff]  ;;  %v269_v30 = vld [vmem:[%s934_s28 + $0x160] sm:$0xff] }
  0x18   : > { %v231_v31 = vld [vmem:[%s934_s28 + $0x30] sm:$0xff]  ;;  %v257_v32 = vld [vmem:[%s934_s28 + $0x100] sm:$0xff]  ;;  %v244_v33 = vld [vmem:[%s934_s28 + $0x98] sm:$0xff] }
  0x19   : > { %v270_v34 = vld [vmem:[%s934_s28 + $0x168] sm:$0xff]  ;;  %v232_v35 = vld [vmem:[%s934_s28 + $0x38] sm:$0xff]  ;;  %v245_v37 = vld [vmem:[%s934_s28 + $0xa0] sm:$0xff] }
  0x1a   : > { %v258_v36 = vld [vmem:[%s934_s28 + $0x108] sm:$0xff]  ;;  %v271_v38 = vld [vmem:[%s934_s28 + $0x170] sm:$0xff]  ;;  %v233_v39 = vld [vmem:[%s934_s28 + $0x40] sm:$0xff] }
  0x1b   : > { %v259_v40 = vld [vmem:[%s934_s28 + $0x110] sm:$0xff]  ;;  %v246_v41 = vld [vmem:[%s934_s28 + $0xa8] sm:$0xff]  ;;  %v272_v42 = vld [vmem:[%s934_s28 + $0x178] sm:$0xff] }
  0x1c   : > { %v234_v43 = vld [vmem:[%s934_s28 + $0x48] sm:$0xff]  ;;  %v260_v44 = vld [vmem:[%s934_s28 + $0x118] sm:$0xff]  ;;  %v247_v45 = vld [vmem:[%s934_s28 + $0xb0] sm:$0xff] }
  0x1d   : > { %789 = vmatmul.msk.f32.gmra.mxu2 %vm283_vm0, %v251_v8  ;;  %776 = vmatmul.msk.f32.gmra.mxu1 %vm283_vm0, %v238_v9  ;;  %v273_v46 = vld [vmem:[%s934_s28 + $0x180] sm:$0xff]  ;;  %v235_v47 = vld [vmem:[%s934_s28 + $0x50] sm:$0xff]  ;;  %v248_v49 = vld [vmem:[%s934_s28 + $0xb8] sm:$0xff] }
  0x1e   : > { %802 = vmatmul.msk.f32.gmra.mxu3 %vm283_vm0, %v264_v10  ;;  %764 = vmatmul.msk.f32.gmra.mxu0 %vm283_vm0, %v226_v11  ;;  %v261_v48 = vld [vmem:[%s934_s28 + $0x120] sm:$0xff]  ;;  %v274_v50 = vld [vmem:[%s934_s28 + $0x188] sm:$0xff]  ;;  %v236_v51 = vld [vmem:[%s934_s28 + $0x58] sm:$0xff] }
  0x1f   : > { %v262_v52 = vld [vmem:[%s934_s28 + $0x128] sm:$0xff]  ;;  %v249_v53 = vld [vmem:[%s934_s28 + $0xc0] sm:$0xff] }
  0x25   : > { %790 = vmatmul.msk.f32.gmra.mxu2 %vm283_vm0, %v252_v12  ;;  %777 = vmatmul.msk.f32.gmra.mxu1 %vm283_vm0, %v239_v13 }
  0x26   : > { %803 = vmatmul.msk.f32.gmra.mxu3 %vm283_vm0, %v265_v14  ;;  %765 = vmatmul.msk.f32.gmra.mxu0 %vm283_vm0, %v227_v15 }
  0x2d   : > { %791 = vmatmul.msk.f32.gmra.mxu2 %vm283_vm0, %v253_v16  ;;  %778 = vmatmul.msk.f32.gmra.mxu1 %vm283_vm0, %v240_v17 }
  0x2e   : > { %804 = vmatmul.msk.f32.gmra.mxu3 %vm283_vm0, %v266_v18  ;;  %766 = vmatmul.msk.f32.gmra.mxu0 %vm283_vm0, %v228_v19 }
  0x35   : > { %792 = vmatmul.msk.f32.gmra.mxu2 %vm283_vm0, %v254_v20  ;;  %779 = vmatmul.msk.f32.gmra.mxu1 %vm283_vm0, %v241_v21 }
  0x36   : > { %805 = vmatmul.msk.f32.gmra.mxu3 %vm283_vm0, %v267_v22  ;;  %767 = vmatmul.msk.f32.gmra.mxu0 %vm283_vm0, %v229_v23 }
  0x3d   : > { %793 = vmatmul.msk.f32.gmra.mxu2 %vm283_vm0, %v255_v24  ;;  %780 = vmatmul.msk.f32.gmra.mxu1 %vm283_vm0, %v242_v25 }
  0x3e   : > { %806 = vmatmul.msk.f32.gmra.mxu3 %vm283_vm0, %v268_v26  ;;  %768 = vmatmul.msk.f32.gmra.mxu0 %vm283_vm0, %v230_v27 }
  0x45   : > { %794 = vmatmul.msk.f32.gmra.mxu2 %vm283_vm0, %v256_v28  ;;  %781 = vmatmul.msk.f32.gmra.mxu1 %vm283_vm0, %v243_v29 }
  0x46   : > { %807 = vmatmul.msk.f32.gmra.mxu3 %vm283_vm0, %v269_v30  ;;  %769 = vmatmul.msk.f32.gmra.mxu0 %vm283_vm0, %v231_v31 }
  0x4d   : > { %795 = vmatmul.msk.f32.gmra.mxu2 %vm283_vm0, %v257_v32  ;;  %782 = vmatmul.msk.f32.gmra.mxu1 %vm283_vm0, %v244_v33 }
  0x4e   : > { %808 = vmatmul.msk.f32.gmra.mxu3 %vm283_vm0, %v270_v34  ;;  %770 = vmatmul.msk.f32.gmra.mxu0 %vm283_vm0, %v232_v35 }
  0x55   : > { %796 = vmatmul.msk.f32.gmra.mxu2 %vm283_vm0, %v258_v36  ;;  %783 = vmatmul.msk.f32.gmra.mxu1 %vm283_vm0, %v245_v37 }
  0x56   : > { %809 = vmatmul.msk.f32.gmra.mxu3 %vm283_vm0, %v271_v38  ;;  %771 = vmatmul.msk.f32.gmra.mxu0 %vm283_vm0, %v233_v39 }
  0x5d   : > { %797 = vmatmul.msk.f32.gmra.mxu2 %vm283_vm0, %v259_v40  ;;  %784 = vmatmul.msk.f32.gmra.mxu1 %vm283_vm0, %v246_v41 }
  0x5e   : > { %810 = vmatmul.msk.f32.gmra.mxu3 %vm283_vm0, %v272_v42  ;;  %772 = vmatmul.msk.f32.gmra.mxu0 %vm283_vm0, %v234_v43 }
  0x65   : > { %798 = vmatmul.msk.f32.gmra.mxu2 %vm283_vm0, %v260_v44  ;;  %785 = vmatmul.msk.f32.gmra.mxu1 %vm283_vm0, %v247_v45 }
  0x66   : > { %811 = vmatmul.msk.f32.gmra.mxu3 %vm283_vm0, %v273_v46  ;;  %773 = vmatmul.msk.f32.gmra.mxu0 %vm283_vm0, %v235_v47 }
  0x6d   : > { %799 = vmatmul.msk.f32.gmra.mxu2 %vm283_vm0, %v261_v48  ;;  %786 = vmatmul.msk.f32.gmra.mxu1 %vm283_vm0, %v248_v49 }
  0x6e   : > { %812 = vmatmul.msk.f32.gmra.mxu3 %vm283_vm0, %v274_v50  ;;  %774 = vmatmul.msk.f32.gmra.mxu0 %vm283_vm0, %v236_v51 }
  0x75   : > { %800 = vmatmul.msk.f32.gmra.mxu2 %vm283_vm0, %v262_v52  ;;  %787 = vmatmul.msk.f32.gmra.mxu1 %vm283_vm0, %v249_v53 }
  0x92   : > { %v487_v55 = vpop.f32.mrf.mxu1 }
  0x93   : > { %v488_v56 = vadd.f32 %v1039_v54, %v487_v55  ;;  %v451_v57 = vpop.f32.mrf.mxu0 }
  0x94   : > { %v452_v58 = vadd.f32 %v1039_v54, %v451_v57 }
  0x95   : > { %614 = vst.msk [vmem:[%s1046_s6 + $0x60] sm:$0xff] %vm601_vm1, %v488_v56 }
  0x96   : > { %602 = vst.msk [vmem:[%s1046_s6] sm:$0xff] %vm601_vm1, %v452_v58 }
  0x98   : > { %v526_v59 = vpop.f32.mrf.mxu2 }
  0x99   : > { %v527_v60 = vadd.f32 %v1039_v54, %v526_v59  ;;  %v565_v61 = vpop.f32.mrf.mxu3 }
  0x9a   : > { %v490_v62 = vpop.f32.mrf.mxu1  ;;  %v566_v63 = vadd.f32 %v1039_v54, %v565_v61 }
  0x9b   : > { %627 = vst.msk [vmem:[%s1046_s6 + $0xc8] sm:$0xff] %vm601_vm1, %v527_v60  ;;  %v491_v0 = vadd.f32 %v1039_v54, %v490_v62  ;;  %v454_v1 = vpop.f32.mrf.mxu0 }
  0x9c   : > { %640 = vst.msk [vmem:[%s1046_s6 + $0x130] sm:$0xff] %vm601_vm1, %v566_v63  ;;  %v455_v2 = vadd.f32 %v1039_v54, %v454_v1 }
  0x9d   : > { %615 = vst.msk [vmem:[%s1046_s6 + $0x68] sm:$0xff] %vm601_vm1, %v491_v0 }
  0x9e   : > { %603 = vst.msk [vmem:[%s1046_s6 + $0x8] sm:$0xff] %vm601_vm1, %v455_v2 }
  0xa0   : > { %v529_v3 = vpop.f32.mrf.mxu2 }
  0xa1   : > { %v530_v4 = vadd.f32 %v1039_v54, %v529_v3  ;;  %v568_v5 = vpop.f32.mrf.mxu3 }
  0xa2   : > { %v493_v6 = vpop.f32.mrf.mxu1  ;;  %v569_v7 = vadd.f32 %v1039_v54, %v568_v5 }
  0xa3   : > { %628 = vst.msk [vmem:[%s1046_s6 + $0xd0] sm:$0xff] %vm601_vm1, %v530_v4  ;;  %v494_v8 = vadd.f32 %v1039_v54, %v493_v6  ;;  %v457_v9 = vpop.f32.mrf.mxu0 }
  0xa4   : > { %641 = vst.msk [vmem:[%s1046_s6 + $0x138] sm:$0xff] %vm601_vm1, %v569_v7  ;;  %v458_v10 = vadd.f32 %v1039_v54, %v457_v9 }
  0xa5   : > { %616 = vst.msk [vmem:[%s1046_s6 + $0x70] sm:$0xff] %vm601_vm1, %v494_v8 }
  0xa6   : > { %604 = vst.msk [vmem:[%s1046_s6 + $0x10] sm:$0xff] %vm601_vm1, %v458_v10 }
  0xa8   : > { %v532_v11 = vpop.f32.mrf.mxu2 }
  0xa9   : > { %v533_v12 = vadd.f32 %v1039_v54, %v532_v11  ;;  %v571_v13 = vpop.f32.mrf.mxu3 }
  0xaa   : > { %v496_v14 = vpop.f32.mrf.mxu1  ;;  %v572_v15 = vadd.f32 %v1039_v54, %v571_v13 }
  0xab   : > { %629 = vst.msk [vmem:[%s1046_s6 + $0xd8] sm:$0xff] %vm601_vm1, %v533_v12  ;;  %v497_v16 = vadd.f32 %v1039_v54, %v496_v14  ;;  %v460_v17 = vpop.f32.mrf.mxu0 }
  0xac   : > { %642 = vst.msk [vmem:[%s1046_s6 + $0x140] sm:$0xff] %vm601_vm1, %v572_v15  ;;  %v461_v18 = vadd.f32 %v1039_v54, %v460_v17 }
  0xad   : > { %617 = vst.msk [vmem:[%s1046_s6 + $0x78] sm:$0xff] %vm601_vm1, %v497_v16 }
  0xae   : > { %605 = vst.msk [vmem:[%s1046_s6 + $0x18] sm:$0xff] %vm601_vm1, %v461_v18 }
  0xb0   : > { %v535_v19 = vpop.f32.mrf.mxu2 }
  0xb1   : > { %v536_v20 = vadd.f32 %v1039_v54, %v535_v19  ;;  %v574_v21 = vpop.f32.mrf.mxu3 }
  0xb2   : > { %v499_v22 = vpop.f32.mrf.mxu1  ;;  %v575_v23 = vadd.f32 %v1039_v54, %v574_v21 }
  0xb3   : > { %630 = vst.msk [vmem:[%s1046_s6 + $0xe0] sm:$0xff] %vm601_vm1, %v536_v20  ;;  %v500_v24 = vadd.f32 %v1039_v54, %v499_v22  ;;  %v463_v25 = vpop.f32.mrf.mxu0 }
  0xb4   : > { %643 = vst.msk [vmem:[%s1046_s6 + $0x148] sm:$0xff] %vm601_vm1, %v575_v23  ;;  %v464_v26 = vadd.f32 %v1039_v54, %v463_v25 }
  0xb5   : > { %618 = vst.msk [vmem:[%s1046_s6 + $0x80] sm:$0xff] %vm601_vm1, %v500_v24 }
  0xb6   : > { %606 = vst.msk [vmem:[%s1046_s6 + $0x20] sm:$0xff] %vm601_vm1, %v464_v26 }
  0xb8   : > { %v538_v27 = vpop.f32.mrf.mxu2 }
  0xb9   : > { %v539_v28 = vadd.f32 %v1039_v54, %v538_v27  ;;  %v577_v29 = vpop.f32.mrf.mxu3 }
  0xba   : > { %v502_v30 = vpop.f32.mrf.mxu1  ;;  %v578_v31 = vadd.f32 %v1039_v54, %v577_v29 }
  0xbb   : > { %631 = vst.msk [vmem:[%s1046_s6 + $0xe8] sm:$0xff] %vm601_vm1, %v539_v28  ;;  %v503_v32 = vadd.f32 %v1039_v54, %v502_v30  ;;  %v466_v33 = vpop.f32.mrf.mxu0 }
  0xbc   : > { %644 = vst.msk [vmem:[%s1046_s6 + $0x150] sm:$0xff] %vm601_vm1, %v578_v31  ;;  %v467_v34 = vadd.f32 %v1039_v54, %v466_v33 }
  0xbd   : > { %619 = vst.msk [vmem:[%s1046_s6 + $0x88] sm:$0xff] %vm601_vm1, %v503_v32 }
  0xbe   : > { %607 = vst.msk [vmem:[%s1046_s6 + $0x28] sm:$0xff] %vm601_vm1, %v467_v34 }
  0xc0   : > { %v541_v35 = vpop.f32.mrf.mxu2 }
  0xc1   : > { %v542_v36 = vadd.f32 %v1039_v54, %v541_v35  ;;  %v580_v37 = vpop.f32.mrf.mxu3 }
  0xc2   : > { %v505_v38 = vpop.f32.mrf.mxu1  ;;  %v581_v39 = vadd.f32 %v1039_v54, %v580_v37 }
  0xc3   : > { %632 = vst.msk [vmem:[%s1046_s6 + $0xf0] sm:$0xff] %vm601_vm1, %v542_v36  ;;  %v506_v40 = vadd.f32 %v1039_v54, %v505_v38  ;;  %v469_v41 = vpop.f32.mrf.mxu0 }
  0xc4   : > { %645 = vst.msk [vmem:[%s1046_s6 + $0x158] sm:$0xff] %vm601_vm1, %v581_v39  ;;  %v470_v42 = vadd.f32 %v1039_v54, %v469_v41 }
  0xc5   : > { %620 = vst.msk [vmem:[%s1046_s6 + $0x90] sm:$0xff] %vm601_vm1, %v506_v40 }
  0xc6   : > { %608 = vst.msk [vmem:[%s1046_s6 + $0x30] sm:$0xff] %vm601_vm1, %v470_v42 }
  0xc8   : > { %v544_v43 = vpop.f32.mrf.mxu2 }
  0xc9   : > { %v545_v44 = vadd.f32 %v1039_v54, %v544_v43  ;;  %v583_v45 = vpop.f32.mrf.mxu3 }
  0xca   : > { %v508_v46 = vpop.f32.mrf.mxu1  ;;  %v584_v47 = vadd.f32 %v1039_v54, %v583_v45 }
  0xcb   : > { %633 = vst.msk [vmem:[%s1046_s6 + $0xf8] sm:$0xff] %vm601_vm1, %v545_v44  ;;  %v509_v48 = vadd.f32 %v1039_v54, %v508_v46  ;;  %v472_v49 = vpop.f32.mrf.mxu0 }
  0xcc   : > { %646 = vst.msk [vmem:[%s1046_s6 + $0x160] sm:$0xff] %vm601_vm1, %v584_v47  ;;  %v473_v50 = vadd.f32 %v1039_v54, %v472_v49 }
  0xcd   : > { %621 = vst.msk [vmem:[%s1046_s6 + $0x98] sm:$0xff] %vm601_vm1, %v509_v48 }
  0xce   : > { %609 = vst.msk [vmem:[%s1046_s6 + $0x38] sm:$0xff] %vm601_vm1, %v473_v50 }
  0xd0   : > { %v547_v51 = vpop.f32.mrf.mxu2 }
  0xd1   : > { %v548_v52 = vadd.f32 %v1039_v54, %v547_v51  ;;  %v586_v53 = vpop.f32.mrf.mxu3 }
  0xd2   : > { %v511_v55 = vpop.f32.mrf.mxu1  ;;  %v587_v56 = vadd.f32 %v1039_v54, %v586_v53 }
  0xd3   : > { %634 = vst.msk [vmem:[%s1046_s6 + $0x100] sm:$0xff] %vm601_vm1, %v548_v52  ;;  %v512_v57 = vadd.f32 %v1039_v54, %v511_v55  ;;  %v475_v58 = vpop.f32.mrf.mxu0 }
  0xd4   : > { %647 = vst.msk [vmem:[%s1046_s6 + $0x168] sm:$0xff] %vm601_vm1, %v587_v56  ;;  %v476_v59 = vadd.f32 %v1039_v54, %v475_v58 }
  0xd5   : > { %622 = vst.msk [vmem:[%s1046_s6 + $0xa0] sm:$0xff] %vm601_vm1, %v512_v57 }
  0xd6   : > { %610 = vst.msk [vmem:[%s1046_s6 + $0x40] sm:$0xff] %vm601_vm1, %v476_v59 }
  0xd8   : > { %v550_v60 = vpop.f32.mrf.mxu2 }
  0xd9   : > { %v551_v61 = vadd.f32 %v1039_v54, %v550_v60  ;;  %v589_v62 = vpop.f32.mrf.mxu3 }
  0xda   : > { %v514_v63 = vpop.f32.mrf.mxu1  ;;  %v590_v0 = vadd.f32 %v1039_v54, %v589_v62 }
  0xdb   : > { %635 = vst.msk [vmem:[%s1046_s6 + $0x108] sm:$0xff] %vm601_vm1, %v551_v61  ;;  %v515_v1 = vadd.f32 %v1039_v54, %v514_v63  ;;  %v478_v2 = vpop.f32.mrf.mxu0 }
  0xdc   : > { %648 = vst.msk [vmem:[%s1046_s6 + $0x170] sm:$0xff] %vm601_vm1, %v590_v0  ;;  %v479_v3 = vadd.f32 %v1039_v54, %v478_v2 }
  0xdd   : > { %623 = vst.msk [vmem:[%s1046_s6 + $0xa8] sm:$0xff] %vm601_vm1, %v515_v1 }
  0xde   : > { %611 = vst.msk [vmem:[%s1046_s6 + $0x48] sm:$0xff] %vm601_vm1, %v479_v3 }
  0xe0   : > { %v553_v4 = vpop.f32.mrf.mxu2 }
  0xe1   : > { %v554_v5 = vadd.f32 %v1039_v54, %v553_v4  ;;  %v592_v6 = vpop.f32.mrf.mxu3 }
  0xe2   : > { %v517_v7 = vpop.f32.mrf.mxu1  ;;  %v593_v8 = vadd.f32 %v1039_v54, %v592_v6 }
  0xe3   : > { %636 = vst.msk [vmem:[%s1046_s6 + $0x110] sm:$0xff] %vm601_vm1, %v554_v5  ;;  %v518_v9 = vadd.f32 %v1039_v54, %v517_v7  ;;  %v481_v10 = vpop.f32.mrf.mxu0 }
  0xe4   : > { %649 = vst.msk [vmem:[%s1046_s6 + $0x178] sm:$0xff] %vm601_vm1, %v593_v8  ;;  %v482_v11 = vadd.f32 %v1039_v54, %v481_v10 }
  0xe5   : > { %624 = vst.msk [vmem:[%s1046_s6 + $0xb0] sm:$0xff] %vm601_vm1, %v518_v9 }
  0xe6   : > { %612 = vst.msk [vmem:[%s1046_s6 + $0x50] sm:$0xff] %vm601_vm1, %v482_v11 }
  0xe8   : > { %v556_v12 = vpop.f32.mrf.mxu2 }
  0xe9   : > { %v557_v13 = vadd.f32 %v1039_v54, %v556_v12  ;;  %v595_v14 = vpop.f32.mrf.mxu3 }
  0xea   : > { %v520_v15 = vpop.f32.mrf.mxu1  ;;  %v596_v16 = vadd.f32 %v1039_v54, %v595_v14 }
  0xeb   : > { %637 = vst.msk [vmem:[%s1046_s6 + $0x118] sm:$0xff] %vm601_vm1, %v557_v13  ;;  %v521_v17 = vadd.f32 %v1039_v54, %v520_v15  ;;  %v484_v18 = vpop.f32.mrf.mxu0 }
  0xec   : > { %650 = vst.msk [vmem:[%s1046_s6 + $0x180] sm:$0xff] %vm601_vm1, %v596_v16  ;;  %v485_v19 = vadd.f32 %v1039_v54, %v484_v18 }
  0xed   : > { %625 = vst.msk [vmem:[%s1046_s6 + $0xb8] sm:$0xff] %vm601_vm1, %v521_v17 }
  0xee   : > { %613 = vst.msk [vmem:[%s1046_s6 + $0x58] sm:$0xff] %vm601_vm1, %v485_v19 }
  0xf0   : > { %v559_v20 = vpop.f32.mrf.mxu2 }
  0xf1   : > { %v560_v21 = vadd.f32 %v1039_v54, %v559_v20  ;;  %v598_v22 = vpop.f32.mrf.mxu3 }
  0xf2   : > { %v523_v23 = vpop.f32.mrf.mxu1  ;;  %v599_v24 = vadd.f32 %v1039_v54, %v598_v22 }
  0xf3   : > { %638 = vst.msk [vmem:[%s1046_s6 + $0x120] sm:$0xff] %vm601_vm1, %v560_v21  ;;  %v524_v25 = vadd.f32 %v1039_v54, %v523_v23 }
  0xf4   : > { %651 = vst.msk [vmem:[%s1046_s6 + $0x188] sm:$0xff] %vm601_vm1, %v599_v24 }
  0xf5   : > { %626 = vst.msk [vmem:[%s1046_s6 + $0xc0] sm:$0xff] %vm601_vm1, %v524_v25 }
  0xf8   : > { %v562_v26 = vpop.f32.mrf.mxu2 }
  0xf9   : > { %v563_v27 = vadd.f32 %v1039_v54, %v562_v26 }
  0xfb   : > { %639 = vst.msk [vmem:[%s1046_s6 + $0x128] sm:$0xff] %vm601_vm1, %v563_v27 }
  0xfc PF: > { %s13_s14 = sadd.s32 1, %s874_s14   ;;  %s1211_s12 = smov %s870_s13 }
  0xfd   : > { %p10_p5 = scmp.ge.s32.totalorder %s13_s14, 4   ;;  %s1212_s13 = smov %s1214_s15 }
  0xff   :  { %12 = sbr.rel (!%p10_p5) target bundleno = 2 (0x2), region = 68 }

</bundles_post_ra>
